<compile_context>
chip_gen: v6e
topology: v6e:2x2x1
jax: 0.10.0
libtpu: 0.0.40
codegen_flags: <defaults>
</compile_context>

<pallas_src>
import jax
import jax.numpy as jnp
from jax.experimental import pallas as pl
from jax.experimental.pallas import tpu as pltpu


# ---------------------------------------------------------------------------
# Kernel
# ---------------------------------------------------------------------------
def _sarsa_kernel(x_ref, w1_ref, b1_ref, w2_ref, b2_ref, out_ref):
    """One batch tile of the SarsaNet forward pass, batch on the lane axis.

    x_ref  : [S, TILE_B] f32   (batch on lanes -> lane-dense loads)
    w1_ref : [H, S]      f32   (torch fc1.weight layout, VMEM-resident)
    b1_ref : [H, 1]      f32
    w2_ref : [A, H]      f32   (torch fc2.weight layout, VMEM-resident)
    b2_ref : [A, 1]      f32
    out_ref: [A, TILE_B] f32   (lane-dense stores)
    """
    # hidden^T = relu(W1 @ x^T + b1)   -- f32 accumulation on the MXU
    h = jnp.dot(w1_ref[...], x_ref[...], preferred_element_type=jnp.float32)
    h = jnp.maximum(h + b1_ref[...], 0.0)
    # q^T = W2 @ hidden^T + b2
    q = jnp.dot(w2_ref[...], h, preferred_element_type=jnp.float32)
    out_ref[...] = q + b2_ref[...]


# ---------------------------------------------------------------------------
# Tiling policy
# ---------------------------------------------------------------------------
def _round_up(x, m):
    return ((x + m - 1) // m) * m


def _choose_tile_b(batch, max_tile_b):
    """Pick (tile_b, n_tiles) for the batch ("parallel") grid axis.

    - Small batches (typical RL): one grid step with the whole batch; a block
      dim equal to the full array dim is always a legal BlockSpec.
    - Larger batches: an even number of tiles (v7x has 2 TensorCores on the
      "parallel" axis), each as large as possible but capped (max_tile_b)
      so double-buffered VMEM stays well inside every generation's scoped
      default (v5e 16 MiB is the tightest).
    """
    if batch <= 2048:
        return batch, 1
    pairs = pl.cdiv(batch, 2 * max_tile_b)          # how many tile-pairs needed
    tile = min(_round_up(pl.cdiv(batch, 2 * pairs), 512), max_tile_b)
    return tile, pl.cdiv(batch, tile)


# ---------------------------------------------------------------------------
# Forward passes
# ---------------------------------------------------------------------------
def sarsa_net_forward_t(x_t, w1, b1, w2, b2, *, max_tile_b=16384):
    """Lane-dense fast path (recommended): x_t is [S, B], returns q^T as [A, B].

    No padding, no transposes, no dtype casts in the wrapper — the pallas_call
    is the only HBM pass.  The consumer (argmax over actions, TD-target
    gather) can index the [A, B] result directly.
    """
    S, B = x_t.shape
    H = w1.shape[1]
    A = w2.shape[1]

    x_t = jnp.asarray(x_t, jnp.float32)
    w1_t = jnp.asarray(w1, jnp.float32).T          # [H, S]  (tiny)
    w2_t = jnp.asarray(w2, jnp.float32).T          # [A, H]  (tiny)
    b1_t = jnp.asarray(b1, jnp.float32).reshape(H, 1)
    b2_t = jnp.asarray(b2, jnp.float32).reshape(A, 1)

    tile_b, n_tiles = _choose_tile_b(B, max_tile_b)

    return pl.pallas_call(
        _sarsa_kernel,
        out_shape=jax.ShapeDtypeStruct((A, B), jnp.float32),
        grid=(n_tiles,),
        in_specs=[
            # Batch-tiled input; last (partial) tile handled by Pallas masking.
            pl.BlockSpec((S, tile_b), lambda i: (0, i)),
            # Constant index_maps -> weights/biases stay VMEM-resident.
            pl.BlockSpec((H, S), lambda i: (0, 0)),
            pl.BlockSpec((H, 1), lambda i: (0, 0)),
            pl.BlockSpec((A, H), lambda i: (0, 0)),
            pl.BlockSpec((A, 1), lambda i: (0, 0)),
        ],
        out_specs=pl.BlockSpec((A, tile_b), lambda i: (0, i)),
        compiler_params=pltpu.CompilerParams(
            dimension_semantics=("parallel",),      # shard batch tiles over TCs (v7x)
        ),
    )(x_t, w1_t, b1_t, w2_t, b2_t)


def sarsa_net_forward(x, w1, b1, w2, b2, *, max_tile_b=16384):
    """Torch-semantics wrapper: x [B, S] -> q [B, A].

    The in/out transposes here are pure layout plumbing; prefer
    `sarsa_net_forward_t` when the producer/consumer can use [S, B] / [A, B].
    """
    q_t = sarsa_net_forward_t(x.T, w1, b1, w2, b2, max_tile_b=max_tile_b)
    return q_t.T


# ---------------------------------------------------------------------------
# Params + reference
# ---------------------------------------------------------------------------
def init_params(key, state_size, action_size, hidden_size=64):
    """Deterministic init mirroring the torch module:
       fc1.weight: kaiming_uniform (relu), fc2.weight: kaiming_uniform (linear),
       biases: torch Linear default uniform(-1/sqrt(fan_in), 1/sqrt(fan_in))."""
    k1, k2, k3, k4 = jax.random.split(key, 4)

    bound1 = jnp.sqrt(2.0) * jnp.sqrt(3.0 / state_size)
    w1 = jax.random.uniform(k1, (state_size, hidden_size), jnp.float32,
                            minval=-bound1, maxval=bound1)

    bound2 = 1.0 * jnp.sqrt(3.0 / hidden_size)
    w2 = jax.random.uniform(k2, (hidden_size, action_size), jnp.float32,
                            minval=-bound2, maxval=bound2)

    bb1 = 1.0 / jnp.sqrt(state_size)
    b1 = jax.random.uniform(k3, (1, hidden_size), jnp.float32, minval=-bb1, maxval=bb1)
    bb2 = 1.0 / jnp.sqrt(hidden_size)
    b2 = jax.random.uniform(k4, (1, action_size), jnp.float32, minval=-bb2, maxval=bb2)

    return w1, b1, w2, b2


def _reference(x, w1, b1, w2, b2):
    """Pure-JAX f32 reference (matches the torch module's math)."""
    h = jnp.maximum(jnp.dot(x, w1) + b1, 0.0)
    return jnp.dot(h, w2) + b2


# ---------------------------------------------------------------------------
# Demo / self-test
# ---------------------------------------------------------------------------
if __name__ == "__main__":
    key = jax.random.PRNGKey(0)
    kx, kx2, kp = jax.random.split(key, 3)

    batch = 2
    state_size = 8
    action_size = 4
    hidden_size = 32

    w1, b1, w2, b2 = init_params(kp, state_size, action_size, hidden_size)

    # Small torch-semantics batch ([B, S] -> [B, A], single grid step).
    x = jax.random.normal(kx, (batch, state_size), jnp.float32)
    out = jax.block_until_ready(sarsa_net_forward(x, w1, b1, w2, b2))
    ref = _reference(x, w1, b1, w2, b2)
    assert out.shape == (batch, action_size)
    assert jnp.allclose(out, ref, atol=1e-2, rtol=1e-2), "mismatch (small batch)"

    # Larger batch in the producer-friendly [S, B] layout: exercises the
    # multi-tile parallel grid and the ragged (unpadded) final tile.
    big_batch = 5000
    x_big_t = jax.random.normal(kx2, (state_size, big_batch), jnp.float32)  # [S, B]
    out_big_t = jax.block_until_ready(
        sarsa_net_forward_t(x_big_t, w1, b1, w2, b2, max_tile_b=2048))       # 3 tiles, last ragged
    ref_big = _reference(x_big_t.T, w1, b1, w2, b2)
    assert out_big_t.shape == (action_size, big_batch)
    assert jnp.allclose(out_big_t.T, ref_big, atol=1e-2, rtol=1e-2), "mismatch (big batch)"

    print("KERNEL_OK")
</pallas_src>

<mosaic_0001>
module attributes {stable_mosaic.version = 11 : i64} {
  func.func @_sarsa_kernel(%arg0: i32, %arg1: memref<8x2xf32, #tpu.memory_space<vmem>>, %arg2: memref<32x8xf32, #tpu.memory_space<vmem>>, %arg3: memref<32x1xf32, #tpu.memory_space<vmem>>, %arg4: memref<4x32xf32, #tpu.memory_space<vmem>>, %arg5: memref<4x1xf32, #tpu.memory_space<vmem>>, %arg6: memref<4x2xf32, #tpu.memory_space<vmem>>) attributes {dimension_semantics = [#tpu.dimension_semantics<parallel>], iteration_bounds = array<i64: 1>, scalar_prefetch = 0 : i64, scratch_operands = 0 : i64, tpu.core_type = #tpu.core_type<tc>, window_params = [{transform_indices = @transform_0, window_bounds = array<i64: 8, 2>}, {pipeline_mode = #tpu.pipeline_mode<synchronous>, transform_indices = @transform_1, window_bounds = array<i64: 32, 8>}, {pipeline_mode = #tpu.pipeline_mode<synchronous>, transform_indices = @transform_2, window_bounds = array<i64: 32, 1>}, {pipeline_mode = #tpu.pipeline_mode<synchronous>, transform_indices = @transform_3, window_bounds = array<i64: 4, 32>}, {pipeline_mode = #tpu.pipeline_mode<synchronous>, transform_indices = @transform_4, window_bounds = array<i64: 4, 1>}, {transform_indices = @transform_5, window_bounds = array<i64: 4, 2>}]} {
    %c0 = arith.constant 0 : index
    %c0_0 = arith.constant 0 : index
    %0 = vector.load %arg2[%c0, %c0_0] : memref<32x8xf32, #tpu.memory_space<vmem>>, vector<32x8xf32>
    %c0_1 = arith.constant 0 : index
    %c0_2 = arith.constant 0 : index
    %1 = vector.load %arg1[%c0_1, %c0_2] : memref<8x2xf32, #tpu.memory_space<vmem>>, vector<8x2xf32>
    %cst = arith.constant dense<0.000000e+00> : vector<32x2xf32>
    %2 = tpu.matmul %0, %1, %cst {dimension_numbers = #tpu.dot_dimension_numbers<[1], [0], [0], [1], [0, 0, 1, 1], [], []>} : vector<32x8xf32>, vector<8x2xf32>, vector<32x2xf32> -> vector<32x2xf32>
    %c0_3 = arith.constant 0 : index
    %c0_4 = arith.constant 0 : index
    %3 = vector.load %arg3[%c0_3, %c0_4] : memref<32x1xf32, #tpu.memory_space<vmem>>, vector<32x1xf32>
    %4 = vector.broadcast %3 : vector<32x1xf32> to vector<32x2xf32>
    %5 = arith.addf %2, %4 : vector<32x2xf32>
    %cst_5 = arith.constant 0.000000e+00 : f32
    %6 = vector.broadcast %cst_5 : f32 to vector<32x2xf32>
    %7 = arith.maximumf %5, %6 : vector<32x2xf32>
    %c0_6 = arith.constant 0 : index
    %c0_7 = arith.constant 0 : index
    %8 = vector.load %arg4[%c0_6, %c0_7] : memref<4x32xf32, #tpu.memory_space<vmem>>, vector<4x32xf32>
    %cst_8 = arith.constant dense<0.000000e+00> : vector<4x2xf32>
    %9 = tpu.matmul %8, %7, %cst_8 {dimension_numbers = #tpu.dot_dimension_numbers<[1], [0], [0], [1], [0, 0, 1, 1], [], []>} : vector<4x32xf32>, vector<32x2xf32>, vector<4x2xf32> -> vector<4x2xf32>
    %c0_9 = arith.constant 0 : index
    %c0_10 = arith.constant 0 : index
    %10 = vector.load %arg5[%c0_9, %c0_10] : memref<4x1xf32, #tpu.memory_space<vmem>>, vector<4x1xf32>
    %11 = vector.broadcast %10 : vector<4x1xf32> to vector<4x2xf32>
    %12 = arith.addf %9, %11 : vector<4x2xf32>
    %c0_11 = arith.constant 0 : index
    %c0_12 = arith.constant 0 : index
    %13 = vector.load %arg6[%c0_11, %c0_12] : memref<4x2xf32, #tpu.memory_space<vmem>>, vector<4x2xf32>
    tpu.vector_store %arg6[%c0_11, %c0_12], %12 {strides = array<i32>} : memref<4x2xf32, #tpu.memory_space<vmem>>, vector<4x2xf32>,
    return
  }
  func.func @transform_0(%arg0: i32) -> (i32, i32) {
    %c0_i32 = arith.constant 0 : i32
    %c0_i32_0 = arith.constant 0 : i32
    return %c0_i32, %arg0 : i32, i32
  }
  func.func @transform_1(%arg0: i32) -> (i32, i32) {
    %c0_i32 = arith.constant 0 : i32
    %c0_i32_0 = arith.constant 0 : i32
    %c0_i32_1 = arith.constant 0 : i32
    return %c0_i32, %c0_i32_0 : i32, i32
  }
  func.func @transform_2(%arg0: i32) -> (i32, i32) {
    %c0_i32 = arith.constant 0 : i32
    %c0_i32_0 = arith.constant 0 : i32
    %c0_i32_1 = arith.constant 0 : i32
    return %c0_i32, %c0_i32_0 : i32, i32
  }
  func.func @transform_3(%arg0: i32) -> (i32, i32) {
    %c0_i32 = arith.constant 0 : i32
    %c0_i32_0 = arith.constant 0 : i32
    %c0_i32_1 = arith.constant 0 : i32
    return %c0_i32, %c0_i32_0 : i32, i32
  }
  func.func @transform_4(%arg0: i32) -> (i32, i32) {
    %c0_i32 = arith.constant 0 : i32
    %c0_i32_0 = arith.constant 0 : i32
    %c0_i32_1 = arith.constant 0 : i32
    return %c0_i32, %c0_i32_0 : i32, i32
  }
  func.func @transform_5(%arg0: i32) -> (i32, i32) {
    %c0_i32 = arith.constant 0 : i32
    %c0_i32_0 = arith.constant 0 : i32
    return %c0_i32, %arg0 : i32, i32
  }
}

</mosaic_0001>

<bundles_post_ra>
// kernel: tpu_custom_call.1
= control target key start
LH: loop header
LB: loop body
LE: loop exit
PB: predicated region body
PF: predicated region fallthrough
CT: control target
= control target key end

     0   :  { %vm49_vm0 = vcmask 64512   ;;  %v277_v3 = vmov 0   ;;  %v278_v11 = vmov 0.0   ;;  %vm279_vm1 = vmmov 0   ;;  %s350_s0 = inlined_call_operand.vmem [shape: f32[8,2], index: 0, kind: input, shape index: {}]   ;;  %s351_s1 = inlined_call_operand.vmem [shape: f32[32,8], index: 1, kind: input, shape index: {}]   ;;  %s352_s2 = inlined_call_operand.vmem [shape: f32[32,1], index: 2, kind: input, shape index: {}]   ;;  %s353_s4 = inlined_call_operand.vmem [shape: f32[4,1], index: 4, kind: input, shape index: {}]   ;;  %s354_s3 = inlined_call_operand.vmem [shape: f32[4,32], index: 3, kind: input, shape index: {}]   ;;  %s355_s5 = inlined_call_operand.vmem [shape: f32[4,2], index: 5, kind: output, shape index: {}]  }
   0x1   :  { %v24_v0 = vld [vmem:[%s350_s0] sm:$0xff]  ;;  %v21_v2 = vld [vmem:[%s351_s1 + $0x8] sm:$0xff]  ;;  %275 = vset.pattern.permute.xlu0 %v277_v3  ;;  %276 = vset.pattern.permute.xlu1 %v277_v3  ;;  %v22_v4 = vld [vmem:[%s351_s1 + $0x10] sm:$0xff]  ;;  %vm158_vm2 = vcmask 261120   ;;  %vm232_vm3 = vcmask 11264  }
   0x2   :  { %v20_v1 = vld [vmem:[%s351_s1] sm:$0xff]  ;;  %253 = vmatprep.subr.mxu0 %v24_v0  ;;  %v28_v5 = vld [vmem:[%s352_s2 + $0x18] sm:$0xff]  ;;  %v26_v6 = vld [vmem:[%s352_s2 + $0x8] sm:$0xff]  ;;  %261 = vmatprep.subr.mxu1 %v278_v11 }
   0x3   :  { %255 = vmatprep.mubr.msk.f32.mxu0 %vm49_vm0, %v20_v1  ;;  %254 = vmatpush3.msra.mxu0 %v24_v0  ;;  %v27_v7 = vld [vmem:[%s352_s2 + $0x10] sm:$0xff]  ;;  %v23_v8 = vld [vmem:[%s351_s1 + $0x18] sm:$0xff]  ;;  %v25_v9 = vld [vmem:[%s352_s2] sm:$0xff] }
   0x4   :  { %46 = vperm.xlu0 %275, %v28_v5   ;;  %256 = vmatmul.mubr.msk.f32.vlgmr.msra.gmra.mxu0 %vm49_vm0, %v21_v2  ;;  %v152_v10 = vld [vmem:[%s353_s4] sm:$0xf] }
   0x5   :  { %36 = vperm.xlu1 %276, %v26_v6   ;;  %258 = vmatprep.mubr.msk.f32.mxu0 %vm49_vm0, %v22_v4  ;;  %v151_v28 = vld [vmem:[%s354_s3] sm:$0xf] }
   0x6   :  { %269 = vmatprep.mubr.msk.f32.mxu1 %vm279_vm1, %v278_v11 }
   0x8   :  { %41 = vperm.xlu0 %275, %v27_v7   ;;  %259 = vmatmul.mubr.msk.f32.gmra.mxu0 %vm49_vm0, %v23_v8 }
   0x9   :  { %31 = vperm.xlu1 %276, %v25_v9  }
   0xc   :  { %155 = vperm.xlu0 %275, %v152_v10  }
  0x7f   :  { %v47_v12 = vpop.permute.xlu0 %46 }
  0x80   :  { %v37_v13 = vpop.permute.xlu1 %36 }
  0x83   :  { %v42_v17 = vpop.permute.xlu0 %41 }
  0x84   :  { %v32_v19 = vpop.permute.xlu1 %31 }
  0x87   :  { %v156_v29 = vpop.permute.xlu0 %155 }
  0xc4   :  { %v257_v14 = vpop.f32.mrf.mxu0 }
  0xc5   :  { %v134_v21 = vadd.f32 %v257_v14, %v37_v13 }
  0xc6   :  { %v128_v15 = vpop.f32.mrf.mxu0 }
  0xc7   :  { %v129_v24 = vadd.f32 %v128_v15, %v32_v19  ;;  %v148_v26 = vmax.f32 %v134_v21, 0.0 }
  0xc8   :  { %v260_v16 = vpop.f32.mrf.mxu0 }
  0xc9   :  { %v144_v18 = vadd.f32 %v260_v16, %v47_v12  ;;  %v147_v27 = vmax.f32 %v129_v24, 0.0 }
  0xca   :  { %v138_v20 = vpop.f32.mrf.mxu0 }
  0xcb   :  { %v150_v22 = vmax.f32 %v144_v18, 0.0  ;;  %v139_v23 = vadd.f32 %v138_v20, %v42_v17 }
  0xcd   :  { %v149_v25 = vmax.f32 %v139_v23, 0.0  ;;  %262 = vmatpush3.msra.mxu1 %v150_v22 }
  0xce   :  { %263 = vmatprep.subr.mxu1 %v278_v11 }
  0xcf   :  { %264 = vmatpush3.msra.mxu1 %v149_v25 }
  0xd0   :  { %265 = vmatprep.subr.mxu1 %v278_v11 }
  0xd1   :  { %266 = vmatpush3.msra.mxu1 %v148_v26 }
  0xd2   :  { %267 = vmatprep.subr.mxu1 %v278_v11 }
  0xd3   :  { %268 = vmatpush3.msra.mxu1 %v147_v27 }
  0xd4   :  { %270 = vmatmul.mubr.msk.f32.vlgmr.msra.gmra.mxu1 %vm158_vm2, %v151_v28 }
 0x194   :  { %v228_v30 = vpop.f32.mrf.mxu1 }
 0x195   :  { %v229_v31 = vadd.f32 %v228_v30, %v156_v29 }
 0x196   :  { %v271_v32 = vpop.f32.mrf.mxu1 }
 0x197   :  { %233 = vst.msk [vmem:[%s355_s5] sm:$0xf] %vm232_vm3, %v229_v31 }

</bundles_post_ra>
